<compile_context>
chip_gen: v6e
topology: v6e:2x2x1
jax: 0.10.0
libtpu: 0.0.40
codegen_flags: <defaults>
</compile_context>

<pallas_src>
import jax
import jax.numpy as jnp
from jax.experimental import pallas as pl
from jax.experimental.pallas import tpu as pltpu


def _transpose_tile_kernel(x_ref, o_ref):
    # x_ref block: (1, TS, TD) ; o_ref block: (1, TD, TS).
    # The swap of the last two axes runs on the XLU; the kernel is otherwise
    # pure DMA traffic and stays HBM-bandwidth bound.
    o_ref[...] = jnp.swapaxes(x_ref[...], 1, 2)


def _preferred_tile(itemsize: int) -> int:
    """Per-axis tile target giving ~1 MiB blocks regardless of dtype."""
    if itemsize >= 4:
        return 512     # 512 * 512 * 4B  = 1.00 MiB
    if itemsize == 2:
        return 768     # 768 * 768 * 2B  = 1.125 MiB (multiple of 16 sublane pack)
    return 1024        # 1024 * 1024 * 1B = 1.00 MiB (multiple of 32 sublane pack)


def _choose_tile(extent: int, preferred: int) -> int:
    """Block size for a dim that is the lane (last) dim on one side.

    Must be a multiple of 128, or the full array extent (the BlockSpec escape
    hatch for the (8, 128) tiling constraint).  Prefers an even divisor of
    `extent` to avoid a ragged, masked edge tile, as long as that does not
    shrink the tile below `preferred // 2`.
    """
    if extent <= preferred:
        return extent          # full extent: always legal, small enough for VMEM
    for cand in range(preferred, preferred // 2 - 1, -128):
        if extent % cand == 0:
            return cand        # even divisor, multiple of 128 -> no masked edge
    return preferred           # ragged edge tile (masked stores on last block only)


def pallas_transpose_1_2(x: jax.Array) -> jax.Array:
    """Equivalent of torch `x.transpose(1, 2)` for a rank-3 array (B, S, D)."""
    assert x.ndim == 3, "this kernel implements Transpose(1, 2) on a 3-D tensor"
    B, S, D = x.shape
    itemsize = jnp.dtype(x.dtype).itemsize
    preferred = _preferred_tile(itemsize)

    ts = _choose_tile(S, preferred)  # S-tile: sublane dim of input, lane dim of output
    td = _choose_tile(D, preferred)  # D-tile: lane dim of input, sublane dim of output

    # S-tiles innermost: consecutive grid steps write adjacent chunks of the
    # output's minor dimension.
    grid = (B, pl.cdiv(D, td), pl.cdiv(S, ts))

    cost = pl.CostEstimate(
        flops=0,
        transcendentals=0,
        bytes_accessed=2 * B * S * D * itemsize,
    )

    return pl.pallas_call(
        _transpose_tile_kernel,
        out_shape=jax.ShapeDtypeStruct((B, D, S), x.dtype),
        grid_spec=pltpu.PrefetchScalarGridSpec(
            num_scalar_prefetch=0,
            grid=grid,
            in_specs=[
                # (b, j, i) -> input tile at (batch b, S-block i, D-block j)
                pl.BlockSpec((1, ts, td), lambda b, j, i: (b, i, j)),
            ],
            # (b, j, i) -> output tile at (batch b, D-block j, S-block i)
            out_specs=pl.BlockSpec((1, td, ts), lambda b, j, i: (b, j, i)),
        ),
        compiler_params=pltpu.CompilerParams(
            dimension_semantics=("parallel", "parallel", "parallel"),
        ),
        cost_estimate=cost,
    )(x)


if __name__ == "__main__":
    key = jax.random.PRNGKey(0)

    # Primary check: small PatchTST-like shape (batch, seq_len, d_model).
    B, S, D = 2, 16, 32
    x = jax.random.normal(key, (B, S, D), dtype=jnp.float32)
    out = jax.block_until_ready(pallas_transpose_1_2(x))
    ref = jnp.swapaxes(x, 1, 2)
    assert out.shape == (B, D, S)
    assert out.dtype == x.dtype
    assert bool(jnp.array_equal(out, ref))

    # Secondary check: exercises the multi-tile + ragged edge-tile path
    # (D = 640 > 512 and not evenly divisible -> 512 tile + 128 remainder).
    B2, S2, D2 = 2, 8, 640
    x2 = jax.random.normal(jax.random.PRNGKey(1), (B2, S2, D2), dtype=jnp.float32)
    out2 = jax.block_until_ready(pallas_transpose_1_2(x2))
    ref2 = jnp.swapaxes(x2, 1, 2)
    assert out2.shape == (B2, D2, S2)
    assert bool(jnp.array_equal(out2, ref2))

    # Tertiary check: narrow-dtype path (bf16, full-extent small tiles).
    x3 = jax.random.normal(jax.random.PRNGKey(2), (2, 12, 48)).astype(jnp.bfloat16)
    out3 = jax.block_until_ready(pallas_transpose_1_2(x3))
    ref3 = jnp.swapaxes(x3, 1, 2)
    assert out3.shape == (2, 48, 12)
    assert out3.dtype == jnp.bfloat16
    assert bool(jnp.array_equal(out3, ref3))

    print("KERNEL_OK")
</pallas_src>

<mosaic_0001>
module attributes {stable_mosaic.version = 11 : i64} {
  func.func @_transpose_tile_kernel(%arg0: i32, %arg1: i32, %arg2: i32, %arg3: memref<1x16x32xf32, #tpu.memory_space<vmem>>, %arg4: memref<1x32x16xf32, #tpu.memory_space<vmem>>) attributes {dimension_semantics = [#tpu.dimension_semantics<parallel>, #tpu.dimension_semantics<parallel>, #tpu.dimension_semantics<parallel>], iteration_bounds = array<i64: 2, 1, 1>, scalar_prefetch = 0 : i64, scratch_operands = 0 : i64, tpu.core_type = #tpu.core_type<tc>, window_params = [{transform_indices = @transform_0, window_bounds = array<i64: 1, 16, 32>}, {transform_indices = @transform_1, window_bounds = array<i64: 1, 32, 16>}]} {
    %c0 = arith.constant 0 : index
    %c0_0 = arith.constant 0 : index
    %c0_1 = arith.constant 0 : index
    %0 = vector.load %arg3[%c0, %c0_0, %c0_1] : memref<1x16x32xf32, #tpu.memory_space<vmem>>, vector<1x16x32xf32>
    %1 = tpu.transpose %0, [0, 2, 1] : vector<1x16x32xf32> -> vector<1x32x16xf32>
    %c0_2 = arith.constant 0 : index
    %c0_3 = arith.constant 0 : index
    %c0_4 = arith.constant 0 : index
    %2 = vector.load %arg4[%c0_2, %c0_3, %c0_4] : memref<1x32x16xf32, #tpu.memory_space<vmem>>, vector<1x32x16xf32>
    tpu.vector_store %arg4[%c0_2, %c0_3, %c0_4], %1 {strides = array<i32>} : memref<1x32x16xf32, #tpu.memory_space<vmem>>, vector<1x32x16xf32>,
    return
  }
  func.func @transform_0(%arg0: i32, %arg1: i32, %arg2: i32) -> (i32, i32, i32) {
    %c0_i32 = arith.constant 0 : i32
    return %arg0, %arg2, %arg1 : i32, i32, i32
  }
  func.func @transform_1(%arg0: i32, %arg1: i32, %arg2: i32) -> (i32, i32, i32) {
    %c0_i32 = arith.constant 0 : i32
    return %arg0, %arg1, %arg2 : i32, i32, i32
  }
}

</mosaic_0001>

<bundles_post_ra>
// kernel: tpu_custom_call.1
= control target key start
LH: loop header
LB: loop body
LE: loop exit
PB: predicated region body
PF: predicated region fallthrough
CT: control target
= control target key end

     0   :  { %6 = vsyncpa [#allocation3], 0  ;;  %s593_s0 = inlined_call_operand.hbm [shape: f32[2,16,32], index: 0, kind: input, shape index: {}]   ;;  %s594_s1 = inlined_call_operand.vmem [shape: f32[2,32,16], index: 1, kind: output, shape index: {}]  }
   0x1   :  { %8 = vsyncpa [#allocation3 + $0x1], 0  ;;  %s497_s6 = smov 0   ;;  %s499_s7 = smov 0  }
   0x2   :  { %s501_s8 = smov 0   ;;  %s503_s9 = smov 0  }
   0x3   :  { %s505_s10 = smov 0   ;;  %s507_s11 = smov 0  }
   0x4 LB: > { %s331_s12 = sadd.s32 4294967295, %s482_s11   ;;  %s33_s13 = sadd.s32 1, %s478_s10  ;;  %s482_s11 = sphi %s507_s11, %s14_s11   ;;  %s478_s10 = sphi %s505_s10, %s602_s10   ;;  %s474_s9 = sphi %s503_s9, %s601_s9   ;;  %s470_s8 = sphi %s501_s8, %s600_s8   ;;  %s466_s7 = sphi %s499_s7, %s599_s7   ;;  %s462_s6 = sphi %s497_s6, %s598_s6  }
   0x5   : > { %p35_p0 = scmp.ge.s32.totalorder %s33_s13, 2  ;;  %s44_s14 = sadd.s32 1, %s470_s8 }
   0x6   : > { %p51_p1 = scmp.ne.s32.totalorder %s470_s8, %s466_s7  ;;  %p52_p2 = scmp.eq.s32.totalorder %s482_s11, 0 }
   0x7   : > { %s604_s13 = smov (%p35_p0, %s33_s13), 0  ;;  %p57_p4 = scmp.ne.s32.totalorder %s466_s7, %s462_s6 }
   0x8   : > { %p533_p3 = por %p52_p2, %p51_p1  ;;  %s37_s16 = ssub.s32 %s478_s10, %s604_s13 }
   0x9   : > { %p58_p5 = scmp.eq.s32.totalorder %s331_s12, 0  ;;  %p42_p6 = scmp.eq.s32.totalorder %s37_s16, 0 }
   0xa   : > { %p352_p8 = scmp.lt.s32.totalorder %s482_s11, 2  ;;  %s111_s19 = sand.u32 1, %s470_s8  }
   0xb   : > { %p540_p7 = por %p58_p5, %p57_p4  ;;  %s344_s20 = sshll.u32 %s478_s10, 8 }
   0xc   : > { %s546_s18 = scalar_select %p42_p6, %s470_s8, %s44_s14  }
   0xd   : > { %s335_s21 = sshll.u32 %s111_s19, 4  ;;  %s124_s24 = scalar_lea.hbm %s593_s0, %s344_s20 }
   0xe   : > { %s115_s25 = scalar_lea.vmem [#allocation2], %s335_s21  ;;  %p555_p9 = pnand %p352_p8, %p533_p3 }
   0xf   : > { %s125_s26 = sshll.u32 %s115_s25, 4  ;;  %s112_s28 = scalar_lea.sflag [#allocation3], %s111_s19  ;;  %s126_s26 = int_to_ptr.vmem [resolvable:$true] %s125_s26 }
  0x10   : > { %p406_p10 = pneg %p555_p9  ;;  %s417_s29 = scalar_lea.vmem %s126_s26, 256 }
  0x11   : > { %p418_p11 = scmp.ne.s32.totalorder %s126_s26, %s417_s29  ;;  %s484_s30 = smov [#allocation2]  }
  0x12   : > { %s422_s2 = sshll.u32 %s484_s30, 4  ;;  %s423_s2 = int_to_ptr.vmem [resolvable:$false] %s422_s2 }
  0x13   : > { %p420_p12 = pnand %p418_p11, %p406_p10  ;;  %s424_s3 = scalar_lea.vmem %s423_s2, 512 }
  0x14   : > { %p425_p0 = scmp.lt.s32.totalorder %s126_s26, %s423_s2  ;;  %p426_p1 = scmp.lt.s32.totalorder %s424_s3, %s417_s29 }
  0x15   : > { %p421_p13 = pneg %p420_p12 }
  0x16   : > { %p427_p2 = por %p426_p1, %p425_p0 }
  0x18   : > { %p428_p3 = pnand %p427_p2, %p421_p13 }
  0x1a   : > { %431 = shalt.err (!%p428_p3)
}
  0x1b   : > { %s485_s4 = smov 128   ;;  %s486_s5 = smov 8  }
  0x1c   : > { %351 = dma.hbm_to_vmem [thread:$0]  (!%p555_p9), %s124_s24, 256, %s126_s26, %s112_s28, %s485_s4, %s485_s4, %s486_s5  }
  0x1d   : > { %p338_p4 = scmp.ge.s32.totalorder %s482_s11, 1  ;;  %p133_p5 = scmp.lt.s32.totalorder %s482_s11, 3 }
  0x1f   : > { %p134_p6 = pnand %p338_p4, %p133_p5 }
  0x20   : > { %s139_s6 = sand.u32 (!%p134_p6), 1, %s466_s7  }
  0x21   : > { %137 = sbr.rel (%p134_p6) target bundleno = 178 (0xb2), region = 24  ;;  %s339_s12 = sshll.u32 (!%p134_p6), %s139_s6, 4 }
  0x22   : > { %s140_s14 = scalar_lea.sflag (!%p134_p6), [#allocation3], %s139_s6  ;;  %s143_s15 = scalar_lea.vmem (!%p134_p6), [#allocation2], %s339_s12 }
  0x26   : > { %457 = dma.done.wait (%p540_p7), %s140_s14, 256  }
  0x27   : > { %459 = vsyncadd (%p540_p7), %s140_s14, 4294967040  ;;  %v183_v0 = vld [vmem:[%s143_s15] sm:$0xff]  ;;  %v184_v1 = vld [vmem:[%s143_s15 + $0x8] sm:$0xff]  ;;  %p171_p8 = scmp.lt.s32.totalorder %s474_s9, 1  ;;  %vm217_vm0 = vcmask 130048  }
  0x28   : > { %185 = vxpose.xlu0.b32.start [1/2] (short) (narrow) %v183_v0, 32 }
  0x29   : > { %s606_s9 = smov (!%p171_p8, %s474_s9), 1 }
  0x2a   : > { %s345_s16 = sshll.u32 %s606_s9, 5 }
  0x2b   : > { %s181_s21 = scalar_lea.vmem %s594_s1, %s345_s16 }
  0x2c   : > { %186 = vxpose.xlu0.b32.end [2/2] (short) (narrow) %v184_v1, 32 }
  0xa4   : > { %v201_v2 = vpop.trf.xlu0 }
  0xa5   : > { %218 = vst.msk [vmem:[%s181_s21] sm:$0xff] %vm217_vm0, %v201_v2 }
  0xa8   : > { %v202_v3 = vpop.trf.xlu0 }
  0xa9   : > { %219 = vst.msk [vmem:[%s181_s21 + $0x8] sm:$0xff] %vm217_vm0, %v202_v3 }
  0xac   : > { %v203_v4 = vpop.trf.xlu0 }
  0xad   : > { %220 = vst.msk [vmem:[%s181_s21 + $0x10] sm:$0xff] %vm217_vm0, %v203_v4 }
  0xb0   : > { %v204_v5 = vpop.trf.xlu0 }
  0xb1   : > { %221 = vst.msk [vmem:[%s181_s21 + $0x18] sm:$0xff] %vm217_vm0, %v204_v5 }
  0xb2 PF: > { %s14_s11 = sadd.s32 1, %s482_s11   ;;  %s598_s6 = smov %s466_s7 }
  0xb3   : > { %p11_p7 = scmp.ge.s32.totalorder %s14_s11, 4   ;;  %s599_s7 = smov %s470_s8 }
  0xb4   : > { %s600_s8 = smov %s546_s18  ;;  %s601_s9 = smov %s478_s10 }
  0xb5   : > { %s602_s10 = smov %s604_s13  ;;  %13 = sbr.rel (!%p11_p7) target bundleno = 4 (0x4), region = 64 }
  0xba   :  { %258 = vsyncpa [#allocation3], 1 }
  0xbb   :  { %260 = vsyncpa [#allocation3 + $0x1], 1 }

</bundles_post_ra>
